<compile_context>
chip_gen: v6e
topology: v6e:2x2x1
jax: 0.10.0
libtpu: 0.0.40
codegen_flags: <defaults>
</compile_context>

<pallas_src>
import jax
import jax.numpy as jnp
from jax.experimental import pallas as pl
from jax.experimental.pallas import tpu as pltpu

_LANES = 512          # lane-dense last dim (multiple of 128)
_MAX_ROW_TILE = 256   # (256, 512) f32 block = 512 KiB per buffer


def _sigmoid_crisp_kernel(scale_ref, x_ref, o_ref):
    """scale_ref: (1,) f32 in SMEM (scalar prefetch).
    x_ref / o_ref: (TR, LANES) tiles in VMEM, input dtype preserved."""
    scale = scale_ref[0]
    x = x_ref[...].astype(jnp.float32)
    o_ref[...] = jax.nn.sigmoid(x * scale).astype(o_ref.dtype)


def _round_up(n, m):
    return ((n + m - 1) // m) * m


def sigmoid_crisp(x, gamma, smooth=0.01):
    """x: any-shape float tensor (e.g. NCHW). gamma: (1,) parameter."""
    orig_shape = x.shape
    dtype = x.dtype

    total = 1
    for d in orig_shape:
        total *= int(d)

    # ---- lane-dense 2D layout with padding to full tiles -------------------
    rows_needed = -(-total // _LANES)                       # cdiv
    row_tile = min(_MAX_ROW_TILE, _round_up(rows_needed, 16))
    rows = _round_up(rows_needed, row_tile)
    padded_total = rows * _LANES
    grid = (rows // row_tile,)

    x_flat = x.reshape(-1)
    if padded_total > total:
        x_flat = jnp.pad(x_flat, (0, padded_total - total))
    x2d = x_flat.reshape(rows, _LANES)

    # ---- hoist sigmoid(gamma): one scalar, done once in the wrapper --------
    scale = (1.0 / (smooth + jax.nn.sigmoid(gamma.astype(jnp.float32)))).reshape(1)

    itemsize = jnp.dtype(dtype).itemsize
    cost = pl.CostEstimate(
        flops=2 * total,
        transcendentals=total,
        bytes_accessed=2 * total * itemsize,
    )

    out2d = pl.pallas_call(
        _sigmoid_crisp_kernel,
        out_shape=jax.ShapeDtypeStruct((rows, _LANES), dtype),
        grid_spec=pltpu.PrefetchScalarGridSpec(
            num_scalar_prefetch=1,                      # scale -> SMEM
            grid=grid,
            in_specs=[
                pl.BlockSpec((row_tile, _LANES), lambda i, scale_ref: (i, 0)),
            ],
            out_specs=pl.BlockSpec((row_tile, _LANES), lambda i, scale_ref: (i, 0)),
        ),
        compiler_params=pltpu.CompilerParams(
            dimension_semantics=("parallel",),
        ),
        cost_estimate=cost,
    )(scale, x2d)

    out_flat = out2d.reshape(-1)
    if padded_total > total:
        out_flat = out_flat[:total]
    return out_flat.reshape(orig_shape)


# ------------------- pure-JAX reference (for verification) -------------------
def reference_forward(x, gamma, smooth=0.01):
    scale = 1.0 / (smooth + jax.nn.sigmoid(gamma[0].astype(jnp.float32)))
    return jax.nn.sigmoid(x.astype(jnp.float32) * scale).astype(x.dtype)


if __name__ == "__main__":
    key = jax.random.PRNGKey(0)
    B, C, H, W = 2, 4, 16, 16
    x = jax.random.normal(key, (B, C, H, W), jnp.float32)
    gamma = jnp.ones((1,), jnp.float32)   # matches torch.ones(size=(1,)) init
    smooth = 0.01

    out = jax.block_until_ready(sigmoid_crisp(x, gamma, smooth))
    ref = reference_forward(x, gamma, smooth)

    assert out.shape == (B, C, H, W)
    assert out.dtype == x.dtype
    max_err = float(jnp.max(jnp.abs(out - ref)))
    assert max_err < 1e-5, f"kernel/reference mismatch, max abs err = {max_err}"
    print("KERNEL_OK")
</pallas_src>

<mosaic_0001>
module attributes {stable_mosaic.version = 11 : i64} {
  func.func @_sigmoid_crisp_kernel(%arg0: i32, %arg1: memref<1xf32, #tpu.memory_space<smem>>, %arg2: memref<16x512xf32, #tpu.memory_space<vmem>>, %arg3: memref<16x512xf32, #tpu.memory_space<vmem>>) attributes {dimension_semantics = [#tpu.dimension_semantics<parallel>], iteration_bounds = array<i64: 1>, scalar_prefetch = 1 : i64, scratch_operands = 0 : i64, tpu.core_type = #tpu.core_type<tc>, window_params = [{transform_indices = @transform_0, window_bounds = array<i64: 16, 512>}, {transform_indices = @transform_1, window_bounds = array<i64: 16, 512>}]} {
    %c0 = arith.constant 0 : index
    %0 = memref.load %arg1[%c0] : memref<1xf32, #tpu.memory_space<smem>>
    %c0_0 = arith.constant 0 : index
    %c0_1 = arith.constant 0 : index
    %1 = vector.load %arg2[%c0_0, %c0_1] : memref<16x512xf32, #tpu.memory_space<vmem>>, vector<16x512xf32>
    %2 = vector.broadcast %0 : f32 to vector<16x512xf32>
    %3 = arith.mulf %1, %2 : vector<16x512xf32>
    %4 = arith.negf %3 : vector<16x512xf32>
    %5 = math.exp %4 : vector<16x512xf32>
    %cst = arith.constant 1.000000e+00 : f32
    %6 = vector.broadcast %cst : f32 to vector<16x512xf32>
    %7 = arith.addf %6, %5 : vector<16x512xf32>
    %8 = arith.divf %6, %7 : vector<16x512xf32>
    %c0_2 = arith.constant 0 : index
    %c0_3 = arith.constant 0 : index
    %9 = vector.load %arg3[%c0_2, %c0_3] : memref<16x512xf32, #tpu.memory_space<vmem>>, vector<16x512xf32>
    tpu.vector_store %arg3[%c0_2, %c0_3], %8 {strides = array<i32>} : memref<16x512xf32, #tpu.memory_space<vmem>>, vector<16x512xf32>,
    return
  }
  func.func @transform_0(%arg0: i32, %arg1: memref<1xf32, #tpu.memory_space<smem>>) -> (i32, i32) {
    %c0_i32 = arith.constant 0 : i32
    %c0_i32_0 = arith.constant 0 : i32
    return %arg0, %c0_i32 : i32, i32
  }
  func.func @transform_1(%arg0: i32, %arg1: memref<1xf32, #tpu.memory_space<smem>>) -> (i32, i32) {
    %c0_i32 = arith.constant 0 : i32
    %c0_i32_0 = arith.constant 0 : i32
    return %arg0, %c0_i32 : i32, i32
  }
}

</mosaic_0001>

<bundles_post_ra>
// kernel: tpu_custom_call.1
= control target key start
LH: loop header
LB: loop body
LE: loop exit
PB: predicated region body
PF: predicated region fallthrough
CT: control target
= control target key end

     0   :  { %8 = vsyncpa [#allocation5], 0  ;;  %s238_s0 = inlined_call_operand.<no memory space> [shape: f32[1], index: 0, kind: input, shape index: {}]   ;;  %s239_s1 = inlined_call_operand.hbm [shape: f32[16,512], index: 1, kind: input, shape index: {}]   ;;  %s240_s2 = inlined_call_operand.hbm [shape: f32[16,512], index: 2, kind: output, shape index: {}]  }
   0x1   :  { %9 = vsyncpa [#allocation6], 0  ;;  %s204_s9 = smov [#allocation4]  }
   0x2   :  { %s15_s10 = sshll.u32 %s204_s9, 4  ;;  %s16_s10 = int_to_ptr.vmem [resolvable:$true] %s15_s10 }
   0x3   :  { %s168_s11 = scalar_lea.vmem %s16_s10, 1024  ;;  %p173_p1 = scmp.lt.s32.totalorder %s16_s10, %s16_s10 }
   0x4   :  { %p169_p0 = scmp.ne.s32.totalorder %s16_s10, %s168_s11  ;;  %p174_p2 = scmp.lt.s32.totalorder %s168_s11, %s168_s11 }
   0x6   :  { %p175_p3 = por %p174_p2, %p173_p1 }
   0x8   :  { %p176_p4 = pnand %p175_p3, %p169_p0 }
   0xa   :  { %179 = shalt.err (!%p176_p4)
}
   0xb   :  { %s205_s12 = smov 512   ;;  %s206_s13 = smov 32  }
   0xc   :  { %21 = dma.hbm_to_vmem [thread:$0]  %s239_s1, 1024, %s16_s10, [#allocation5], %s205_s12, %s205_s12, %s206_s13  }
   0xd   :  { %200 = dma.done.wait [#allocation5], 1024  }
   0xe   :  { %201 = vsyncadd [#allocation5], 4294966272  ;;  %v34_v0 = vstv %s238_s0  ;;  %v26_v1 = vld [vmem:[#allocation4] sm:$0xff]  ;;  %v27_v2 = vld [vmem:[#allocation4 + $0x8] sm:$0xff]  ;;  %s207_s0 = smov [#allocation7]  }
   0xf   :  { %v28_v3 = vld [vmem:[#allocation4 + $0x10] sm:$0xff]  ;;  %v35_v4 = vmul.f32 %v34_v0, %v26_v1  ;;  %v36_v5 = vmul.f32 %v34_v0, %v27_v2  ;;  %v29_v7 = vld [vmem:[#allocation4 + $0x18] sm:$0xff]  ;;  %v30_v8 = vld [vmem:[#allocation4 + $0x20] sm:$0xff]  ;;  %s104_s1 = sshll.u32 %s207_s0, 4  ;;  %s105_s1 = int_to_ptr.vmem [resolvable:$true] %s104_s1 }
  0x10   :  { %v37_v6 = vmul.f32 %v34_v0, %v28_v3  ;;  %v31_v9 = vld [vmem:[#allocation4 + $0x28] sm:$0xff]  ;;  %v38_v10 = vmul.f32 %v34_v0, %v29_v7  ;;  %v39_v11 = vmul.f32 %v34_v0, %v30_v8  ;;  %v32_v13 = vld [vmem:[#allocation4 + $0x30] sm:$0xff]  ;;  %v33_v14 = vld [vmem:[#allocation4 + $0x38] sm:$0xff]  ;;  %s180_s18 = scalar_lea.vmem %s105_s1, 1024  ;;  %p185_p6 = scmp.lt.s32.totalorder %s105_s1, %s105_s1 }
  0x11   :  { %v40_v12 = vmul.f32 %v34_v0, %v31_v9  ;;  %v116_v15 = vmul.f32 -1.442695, %v35_v4  ;;  %v117_v16 = vmul.f32 -1.442695, %v36_v5  ;;  %v41_v18 = vmul.f32 %v34_v0, %v32_v13  ;;  %p181_p5 = scmp.ne.s32.totalorder %s105_s1, %s180_s18  ;;  %p186_p7 = scmp.lt.s32.totalorder %s180_s18, %s180_s18 }
  0x12   :  { %v118_v17 = vmul.f32 -1.442695, %v37_v6  ;;  %v119_v19 = vmul.f32 -1.442695, %v38_v10  ;;  %v42_v20 = vmul.f32 %v34_v0, %v33_v14  ;;  %v120_v21 = vmul.f32 -1.442695, %v39_v11 }
  0x13   :  { %128 = vpow2.f32 %v116_v15  ;;  %v121_v22 = vmul.f32 -1.442695, %v40_v12  ;;  %v122_v23 = vmul.f32 -1.442695, %v41_v18  ;;  %p187_p8 = por %p186_p7, %p185_p6 }
  0x14   :  { %130 = vpow2.f32 %v117_v16  ;;  %v123_v24 = vmul.f32 -1.442695, %v42_v20 }
  0x15   :  { %132 = vpow2.f32 %v118_v17  ;;  %p188_p9 = pnand %p187_p8, %p181_p5 }
  0x16   :  { %134 = vpow2.f32 %v119_v19 }
  0x17   :  { %136 = vpow2.f32 %v120_v21 }
  0x18   :  { %138 = vpow2.f32 %v121_v22 }
  0x19   :  { %140 = vpow2.f32 %v122_v23 }
  0x1a   :  { %142 = vpow2.f32 %v123_v24 }
  0x20   :  { %v129_v25 = vpop.eup %128 }
  0x21   :  { %v131_v26 = vpop.eup %130  ;;  %v67_v27 = vadd.f32 1.0, %v129_v25 }
  0x22   :  { %v133_v28 = vpop.eup %132  ;;  %v68_v29 = vadd.f32 1.0, %v131_v26 }
  0x23   :  { %v135_v30 = vpop.eup %134  ;;  %144 = vrcp.f32 %v67_v27  ;;  %v69_v31 = vadd.f32 1.0, %v133_v28 }
  0x24   :  { %v137_v32 = vpop.eup %136  ;;  %146 = vrcp.f32 %v68_v29  ;;  %v70_v33 = vadd.f32 1.0, %v135_v30 }
  0x25   :  { %v139_v34 = vpop.eup %138  ;;  %148 = vrcp.f32 %v69_v31  ;;  %v71_v35 = vadd.f32 1.0, %v137_v32 }
  0x26   :  { %v141_v36 = vpop.eup %140  ;;  %150 = vrcp.f32 %v70_v33  ;;  %v72_v37 = vadd.f32 1.0, %v139_v34 }
  0x27   :  { %v143_v38 = vpop.eup %142  ;;  %152 = vrcp.f32 %v71_v35  ;;  %v73_v39 = vadd.f32 1.0, %v141_v36 }
  0x28   :  { %154 = vrcp.f32 %v72_v37  ;;  %v74_v40 = vadd.f32 1.0, %v143_v38 }
  0x29   :  { %156 = vrcp.f32 %v73_v39 }
  0x2a   :  { %158 = vrcp.f32 %v74_v40 }
  0x30   :  { %v145_v41 = vpop.eup %144 }
  0x31   :  { %v147_v42 = vpop.eup %146  ;;  %91 = vst [vmem:[#allocation7] sm:$0xff] %v145_v41 }
  0x32   :  { %v149_v43 = vpop.eup %148  ;;  %92 = vst [vmem:[#allocation7 + $0x8] sm:$0xff] %v147_v42 }
  0x33   :  { %v151_v44 = vpop.eup %150  ;;  %93 = vst [vmem:[#allocation7 + $0x10] sm:$0xff] %v149_v43 }
  0x34   :  { %v153_v45 = vpop.eup %152  ;;  %94 = vst [vmem:[#allocation7 + $0x18] sm:$0xff] %v151_v44 }
  0x35   :  { %v155_v46 = vpop.eup %154  ;;  %95 = vst [vmem:[#allocation7 + $0x20] sm:$0xff] %v153_v45 }
  0x36   :  { %v157_v47 = vpop.eup %156  ;;  %96 = vst [vmem:[#allocation7 + $0x28] sm:$0xff] %v155_v46 }
  0x37   :  { %v159_v48 = vpop.eup %158  ;;  %97 = vst [vmem:[#allocation7 + $0x30] sm:$0xff] %v157_v47 }
  0x38   :  { %98 = vst [vmem:[#allocation7 + $0x38] sm:$0xff] %v159_v48 }
  0x39   :  { %191 = shalt.err (!%p188_p9)
}
  0x3a   :  { %110 = dma.vmem_to_hbm [thread:$0]  %s105_s1, 1024, %s240_s2, [#allocation6], %s205_s12, %s205_s12, %s206_s13  }
  0x3b   :  { %202 = dma.done.wait [#allocation6], 1024  }
  0x3c   :  { %203 = vsyncadd [#allocation6], 4294966272 }
  0x3d   :  { %114 = vsyncpa [#allocation5], 1 }
  0x3e   :  { %115 = vsyncpa [#allocation6], 1 }

</bundles_post_ra>
